<compile_context>
chip_gen: v7x
topology: tpu7x:2x2x1
jax: 0.10.0
libtpu: 0.0.40
codegen_flags: <defaults>
</compile_context>

<pallas_src>
import functools

import jax
import jax.numpy as jnp
import numpy as np
from jax.experimental import pallas as pl
from jax.experimental.pallas import tpu as pltpu

MIN_FVALUE = -6.0
MAX_FVALUE = 6.0

N_DNP, N_BIN, N_PROB, N_CONT, N_BOX, N_QUANT, N_ENUM = 2, 2, 2, 4, 2, 2, 2
F_IN = N_DNP + N_BIN + N_PROB + N_CONT + N_BOX + N_QUANT + N_ENUM           # 16
M_QUANT = 5                                  # quantile boundaries per feature
ENUM_SIZES = (3, 4)                          # len(possible_values) per enum feature
N_ENUM_OUT = sum(ENUM_SIZES)                 # 7
F_OUT = N_DNP + N_BIN + N_PROB + N_CONT + N_BOX + N_QUANT + N_ENUM_OUT      # 21
F_OUT_PAD = 24                               # padded to 3 full 8-sublane slabs

# ---- kernel feature-row layout ([F_IN, B]); no group crosses a sublane tile ----
R_DNP, R_BIN, R_CONT = 0, 2, 4               # input slab 0 (rows 0:8)
R_PROB, R_BOX, R_QUANT, R_ENUM = 8, 10, 12, 14   # input slab 1 (rows 8:16)
O_DNP, O_BIN, O_CONT = 0, 2, 4               # output slab A (rows 0:8)
O_PROB, O_BOX, O_QUANT = 8, 10, 12           # output slab B (rows 8:16, 2 pad)
O_ENUM = 16                                  # output slab C (rows 16:23, 1 pad)

# ---- module-order column offsets (the PyTorch Ftype iteration order) ----
MOD_DNP, MOD_BIN, MOD_PROB, MOD_CONT = 0, 2, 4, 6
MOD_BOX, MOD_QUANT, MOD_ENUM = 10, 12, 14

# kernel input row r is fed by module input column IN_PERM[r]
IN_PERM = np.array(
    [MOD_DNP, MOD_DNP + 1, MOD_BIN, MOD_BIN + 1,
     MOD_CONT, MOD_CONT + 1, MOD_CONT + 2, MOD_CONT + 3,
     MOD_PROB, MOD_PROB + 1, MOD_BOX, MOD_BOX + 1,
     MOD_QUANT, MOD_QUANT + 1, MOD_ENUM, MOD_ENUM + 1], np.int32)
# module output column j lives at kernel output row OUT_ROWS[j]
OUT_ROWS = np.array(
    [O_DNP, O_DNP + 1, O_BIN, O_BIN + 1, O_PROB, O_PROB + 1,
     O_CONT, O_CONT + 1, O_CONT + 2, O_CONT + 3,
     O_BOX, O_BOX + 1, O_QUANT, O_QUANT + 1]
    + [O_ENUM + i for i in range(N_ENUM_OUT)], np.int32)

# ---- packed parameters: ONE [P_LEN, 1] f32 operand.  Each group's start row is
#      congruent (mod 8) to the feature rows it multiplies, so the [n,1]*[n,TB]
#      broadcasts need no sublane rotate.  Reciprocals are pre-folded. ----
P_CONT_MEAN = 4         # mod 8 == 4  (CONT feature rows 4:8)
P_BOX_SHIFT = 10        # mod 8 == 2  (BOX feature rows 10:12)
P_CONT_INV_STD = 12
P_BOX_LAMBDA = 18
P_Q_MAX = 20            # mod 8 == 4  (QUANT feature rows 12:14)
P_BOX_INV_LAMBDA = 26
P_Q_MIN = 28
P_BOX_MEAN = 34
P_Q_INV_NQ = 36
P_BOX_INV_STD = 42
P_Q_BOUND = 44          # boundary m lives at rows P_Q_BOUND + 8*m : +2
P_ENUM0 = 80
P_ENUM1 = P_ENUM0 + ENUM_SIZES[0]   # 83
P_LEN = 88

TB_DEFAULT = 8192       # batch lanes per grid step (multiple of 128)


def _round_up(v, m):
    return ((v + m - 1) // m) * m


def preprocessor_kernel(x_ref, p_ref, prm_ref, out_ref):
    f32 = jnp.float32
    tb = x_ref.shape[1]
    prm = prm_ref[...]                          # [P_LEN, 1] f32 (tiny)

    def clip(v):
        return jnp.clip(v, MIN_FVALUE, MAX_FVALUE)

    # presence: two aligned 8-row int8 -> f32 conversions (no full-tile temp).
    presA = p_ref[0:8, :].astype(f32)           # DNP | BIN | CONT
    presB = p_ref[8:16, :].astype(f32)          # PROB | BOX | QUANT | ENUM

    # ---------------- output slab A (rows 0:8): DNP(2) | BIN(2) | CONT(4) ----
    o_dnp = x_ref[R_DNP:R_DNP + N_DNP, :] * presA[0:2]          # no clamp (module)
    o_bin = clip(jnp.where(x_ref[R_BIN:R_BIN + N_BIN, :] == 0.0, 0.0, presA[2:4]))
    cm = prm[P_CONT_MEAN:P_CONT_MEAN + N_CONT]                   # [4,1]
    cis = prm[P_CONT_INV_STD:P_CONT_INV_STD + N_CONT]
    o_cont = clip((x_ref[R_CONT:R_CONT + N_CONT, :] - cm) * cis * presA[4:8])
    out_ref[0:8, :] = jnp.concatenate(
        [o_dnp, o_bin, o_cont], axis=0).astype(out_ref.dtype)

    # ---------------- output slab B (rows 8:16): PROB(2) | BOX(2) | QUANT(2) | pad(2)
    # One EUP log pass over a 6/8-dense slab: [b ; 1-b ; boxcox_base].
    b = jnp.clip(x_ref[R_PROB:R_PROB + N_PROB, :], 1e-5, 1.0 - 1e-5)
    sh = prm[P_BOX_SHIFT:P_BOX_SHIFT + N_BOX]
    base = jnp.maximum(x_ref[R_BOX:R_BOX + N_BOX, :] + sh, 1e-6)   # base > 0
    logs = jnp.log(jnp.concatenate([b, 1.0 - b, base], axis=0))    # [6, TB]

    # PROBABILITY: -log(1/b - 1) == log(b) - log(1-b)
    o_prob = clip((logs[0:2] - logs[2:4]) * presB[0:2])

    # BOXCOX: pow(base, lam) == exp(lam * log(base))  (base clamped > 0 above)
    lam = prm[P_BOX_LAMBDA:P_BOX_LAMBDA + N_BOX]
    ilam = prm[P_BOX_INV_LAMBDA:P_BOX_INV_LAMBDA + N_BOX]
    bmn = prm[P_BOX_MEAN:P_BOX_MEAN + N_BOX]
    bis = prm[P_BOX_INV_STD:P_BOX_INV_STD + N_BOX]
    bx = (jnp.exp(lam * logs[4:6]) - 1.0) * ilam
    o_box = clip((bx - bmn) * bis * presB[2:4])

    # QUANTILE (quantile_boundary_mask is all-ones in the module, so
    # masked_input == input); boundary loop unrolled over M_QUANT = 5.
    xq = x_ref[R_QUANT:R_QUANT + N_QUANT, :]
    qmax = prm[P_Q_MAX:P_Q_MAX + N_QUANT]
    qmin = prm[P_Q_MIN:P_Q_MIN + N_QUANT]
    inv_nq = prm[P_Q_INV_NQ:P_Q_INV_NQ + N_QUANT]
    interp_left = jnp.full_like(xq, -1e20)
    interp_right = jnp.full_like(xq, 1e20)
    left_count = jnp.zeros_like(xq)
    for m in range(M_QUANT):
        qb = prm[P_Q_BOUND + 8 * m:P_Q_BOUND + 8 * m + N_QUANT]   # [2,1]
        geq = xq >= qb
        interp_left = jnp.maximum(interp_left, jnp.where(geq, qb, -1e20))
        interp_right = jnp.minimum(interp_right, jnp.where(geq, 1e20, qb))
        left_count = left_count + jnp.where(geq, 1.0, 0.0)
    max_clamp = jnp.where(xq >= qmax, 1.0, 0.0)
    min_clamp = jnp.where(xq <= qmin, 1.0, 0.0)
    interpolate = jnp.where(min_clamp + max_clamp < 0.01, 1.0, 0.0)
    interp_vals = (left_count - 1.0 +
                   (xq - interp_left) / (interp_right + 1e-6 - interp_left)
                   ) * inv_nq
    o_quant = clip((max_clamp + interpolate * interp_vals) * presB[4:6])

    pad2 = jnp.zeros((2, tb), f32)
    out_ref[8:16, :] = jnp.concatenate(
        [o_prob, o_box, o_quant, pad2], axis=0).astype(out_ref.dtype)

    # ---------------- output slab C (rows 16:24): ENUM one-hots(7) | pad(1) ----
    # (x == v) * presence == where(x == v, presence, 0); no clamp in reference.
    xe = x_ref[R_ENUM:R_ENUM + N_ENUM, :]                        # [2, TB]
    ev0 = prm[P_ENUM0:P_ENUM0 + ENUM_SIZES[0]]                   # [3, 1]
    ev1 = prm[P_ENUM1:P_ENUM1 + ENUM_SIZES[1]]                   # [4, 1]
    oh0 = jnp.where(xe[0:1, :] == ev0, presB[6:7], 0.0)          # [3, TB]
    oh1 = jnp.where(xe[1:2, :] == ev1, presB[7:8], 0.0)          # [4, TB]
    pad1 = jnp.zeros((1, tb), f32)
    out_ref[16:24, :] = jnp.concatenate(
        [oh0, oh1, pad1], axis=0).astype(out_ref.dtype)


@functools.partial(jax.jit, static_argnames=("tb", "out_dtype"))
def preprocess_feature_major(x_km, p_km, packed_params, *, tb=TB_DEFAULT,
                             out_dtype=jnp.float32):
    """Fast path: x_km [F_IN, B] f32, p_km [F_IN, B] int8 (kernel row order).

    Returns [F_OUT_PAD, B] (kernel row order; pad rows are zero).
    """
    assert x_km.shape[0] == F_IN and p_km.shape[0] == F_IN
    assert tb % 128 == 0 and tb >= 128
    n_b = x_km.shape[1]

    # Don't allocate a wastefully huge block for tiny batches.
    tb_eff = min(tb, _round_up(n_b, 128))
    n_tiles = -(-n_b // tb_eff)
    # v7x has 2 TensorCores; make sure a non-trivial batch yields >= 2 parallel
    # grid steps so the "parallel" axis can shard across both cores.
    if n_tiles < 2 and n_b > 128:
        tb_eff = _round_up(-(-n_b // 2), 128)
        n_tiles = -(-n_b // tb_eff)

    cp = dict(dimension_semantics=("parallel",))
    # Working set at the default tile is ~3 MiB double-buffered; only very large
    # tiles need an explicit limit (v5e default scoped VMEM is ~16 MiB).
    if tb_eff >= 32768:
        cp["vmem_limit_bytes"] = 64 * 1024 * 1024

    return pl.pallas_call(
        preprocessor_kernel,
        out_shape=jax.ShapeDtypeStruct((F_OUT_PAD, n_b), out_dtype),
        grid=(n_tiles,),
        in_specs=[
            pl.BlockSpec((F_IN, tb_eff), lambda i: (0, i)),
            pl.BlockSpec((F_IN, tb_eff), lambda i: (0, i)),
            pl.BlockSpec((P_LEN, 1), lambda i: (0, 0)),
        ],
        out_specs=pl.BlockSpec((F_OUT_PAD, tb_eff), lambda i: (0, i)),
        compiler_params=pltpu.CompilerParams(**cp),
    )(x_km, p_km, packed_params)


@functools.partial(jax.jit, static_argnames=("tb", "out_dtype"))
def preprocess(x, presence, packed_params, *, tb=TB_DEFAULT, out_dtype=jnp.float32):
    """Module-compatible wrapper: x [B, F_IN], presence [B, F_IN] -> [B, F_OUT]
    in the original Ftype column order (relayout happens here, not on the fast path)."""
    x_km = x.astype(jnp.float32)[:, IN_PERM].T            # [F_IN, B]
    p_km = presence.astype(jnp.int8)[:, IN_PERM].T        # [F_IN, B]
    out_km = preprocess_feature_major(x_km, p_km, packed_params,
                                      tb=tb, out_dtype=out_dtype)
    return out_km[OUT_ROWS, :].T                           # [B, F_OUT]


def make_params():
    """Deterministic synthetic normalization parameters (no checkpoint load)."""
    return dict(
        cont_means=np.array([0.1, -0.2, 0.3, 0.0], np.float32),
        cont_stds=np.array([1.0, 2.0, 0.5, 1.5], np.float32),
        box_shifts=np.array([1.0, 2.0], np.float32),
        box_lambdas=np.array([0.5, 2.0], np.float32),
        box_means=np.array([0.0, 1.0], np.float32),
        box_stds=np.array([1.0, 0.5], np.float32),
        quantiles=np.array([[0.0, 0.25, 0.5, 0.75, 1.0],
                            [-1.0, -0.5, 0.0, 0.5, 1.0]], np.float32),
        enum_values=(np.array([0.0, 1.0, 2.0], np.float32),
                     np.array([10.0, 20.0, 30.0, 40.0], np.float32)),
    )


def pack_params(raw):
    """Pack all parameters into one [P_LEN, 1] f32 array (reciprocals folded)."""
    p = np.zeros((P_LEN, 1), np.float32)
    p[P_CONT_MEAN:P_CONT_MEAN + N_CONT, 0] = raw["cont_means"]
    p[P_CONT_INV_STD:P_CONT_INV_STD + N_CONT, 0] = 1.0 / raw["cont_stds"]
    p[P_BOX_SHIFT:P_BOX_SHIFT + N_BOX, 0] = raw["box_shifts"]
    p[P_BOX_LAMBDA:P_BOX_LAMBDA + N_BOX, 0] = raw["box_lambdas"]
    p[P_BOX_INV_LAMBDA:P_BOX_INV_LAMBDA + N_BOX, 0] = 1.0 / raw["box_lambdas"]
    p[P_BOX_MEAN:P_BOX_MEAN + N_BOX, 0] = raw["box_means"]
    p[P_BOX_INV_STD:P_BOX_INV_STD + N_BOX, 0] = 1.0 / raw["box_stds"]
    p[P_Q_MAX:P_Q_MAX + N_QUANT, 0] = raw["quantiles"].max(axis=1)
    p[P_Q_MIN:P_Q_MIN + N_QUANT, 0] = raw["quantiles"].min(axis=1)
    p[P_Q_INV_NQ:P_Q_INV_NQ + N_QUANT, 0] = 1.0 / float(raw["quantiles"].shape[1] - 1)
    for m in range(M_QUANT):
        p[P_Q_BOUND + 8 * m:P_Q_BOUND + 8 * m + N_QUANT, 0] = raw["quantiles"][:, m]
    p[P_ENUM0:P_ENUM0 + ENUM_SIZES[0], 0] = raw["enum_values"][0]
    p[P_ENUM1:P_ENUM1 + ENUM_SIZES[1], 0] = raw["enum_values"][1]
    return jnp.asarray(p)


def reference(x, presence, raw):
    """Pure-JAX mirror of the PyTorch forward (eval mode), module column order."""
    x = x.astype(jnp.float32)
    p = presence.astype(jnp.float32)
    cm = jnp.asarray(raw["cont_means"])[None, :]
    cs = jnp.asarray(raw["cont_stds"])[None, :]
    bsh = jnp.asarray(raw["box_shifts"])[None, :]
    bla = jnp.asarray(raw["box_lambdas"])[None, :]
    bmn = jnp.asarray(raw["box_means"])[None, :]
    bst = jnp.asarray(raw["box_stds"])[None, :]
    qb = jnp.asarray(raw["quantiles"])                       # [N_QUANT, M]

    outs = []
    outs.append(x[:, MOD_DNP:MOD_DNP + N_DNP] * p[:, MOD_DNP:MOD_DNP + N_DNP])
    o = (1.0 - (x[:, MOD_BIN:MOD_BIN + N_BIN] == 0.0).astype(jnp.float32)
         ) * p[:, MOD_BIN:MOD_BIN + N_BIN]
    outs.append(jnp.clip(o, MIN_FVALUE, MAX_FVALUE))
    b = jnp.clip(x[:, MOD_PROB:MOD_PROB + N_PROB], 1e-5, 1 - 1e-5)
    o = -jnp.log(1.0 / b - 1.0) * p[:, MOD_PROB:MOD_PROB + N_PROB]
    outs.append(jnp.clip(o, MIN_FVALUE, MAX_FVALUE))
    o = (x[:, MOD_CONT:MOD_CONT + N_CONT] - cm) / cs * p[:, MOD_CONT:MOD_CONT + N_CONT]
    outs.append(jnp.clip(o, MIN_FVALUE, MAX_FVALUE))
    bx = (jnp.power(jnp.maximum(x[:, MOD_BOX:MOD_BOX + N_BOX] + bsh, 1e-6), bla)
          - 1.0) / bla
    o = (bx - bmn) / bst * p[:, MOD_BOX:MOD_BOX + N_BOX]
    outs.append(jnp.clip(o, MIN_FVALUE, MAX_FVALUE))
    nq = float(M_QUANT - 1)
    for k in range(N_QUANT):
        xk = x[:, MOD_QUANT + k:MOD_QUANT + k + 1]
        pk = p[:, MOD_QUANT + k:MOD_QUANT + k + 1]
        qbk = qb[k:k + 1, :]
        geq = (xk >= qbk).astype(jnp.float32)
        less = (xk < qbk).astype(jnp.float32)
        maxc = (xk >= qbk.max()).astype(jnp.float32)
        minc = (xk <= qbk.min()).astype(jnp.float32)
        interp = ((minc + maxc) < 0.01).astype(jnp.float32)
        il = jnp.max(geq * qbk + less * (-1e20), axis=1, keepdims=True)
        ir = jnp.min(less * qbk + geq * (1e20), axis=1, keepdims=True)
        ls = jnp.sum(geq, axis=1, keepdims=True) - 1.0
        iv = (ls + (xk - il) / (ir + 1e-6 - il)) / nq
        outs.append(jnp.clip((maxc + interp * iv) * pk, MIN_FVALUE, MAX_FVALUE))
    for e, ev in enumerate(raw["enum_values"]):
        xe = x[:, MOD_ENUM + e:MOD_ENUM + e + 1]
        pe = p[:, MOD_ENUM + e:MOD_ENUM + e + 1]
        outs.append((xe == jnp.asarray(ev)[None, :]).astype(jnp.float32) * pe)
    return jnp.concatenate(outs, axis=1)


def make_inputs(batch, key):
    ks = jax.random.split(key, 7)
    x = jax.random.normal(ks[0], (batch, F_IN), jnp.float32)
    x = x.at[:, MOD_BIN:MOD_BIN + N_BIN].set(
        jax.random.randint(ks[1], (batch, N_BIN), 0, 3).astype(jnp.float32))
    x = x.at[:, MOD_PROB:MOD_PROB + N_PROB].set(
        jax.random.uniform(ks[2], (batch, N_PROB), jnp.float32))
    x = x.at[:, MOD_QUANT:MOD_QUANT + N_QUANT].set(
        jax.random.uniform(ks[3], (batch, N_QUANT), jnp.float32, -1.2, 1.2))
    x = x.at[:, MOD_ENUM].set(
        jax.random.randint(ks[4], (batch,), 0, 4).astype(jnp.float32))
    x = x.at[:, MOD_ENUM + 1].set(
        (jax.random.randint(ks[5], (batch,), 1, 5) * 10).astype(jnp.float32))
    presence = (jax.random.uniform(ks[6], (batch, F_IN)) > 0.2).astype(jnp.uint8)
    return x, presence


if __name__ == "__main__":
    raw = make_params()
    packed = pack_params(raw)
    key = jax.random.PRNGKey(0)
    k_a, k_b = jax.random.split(key)

    # (1) Module-interface wrapper, single exact tile (B=128, tb=128).
    x, presence = make_inputs(128, k_a)
    out = jax.block_until_ready(preprocess(x, presence, packed, tb=128))
    ref = reference(x, presence, raw)
    np.testing.assert_allclose(np.asarray(out), np.asarray(ref),
                               rtol=1e-5, atol=1e-4)
    assert out.shape == (128, F_OUT)

    # (2) Feature-major fast path, ragged multi-tile grid (B=300, tb=256 ->
    #     2 grid steps, second block only 44 lanes valid).
    x2, presence2 = make_inputs(300, k_b)
    x_km = jnp.asarray(x2)[:, IN_PERM].T.astype(jnp.float32)
    p_km = jnp.asarray(presence2)[:, IN_PERM].T.astype(jnp.int8)
    out_km = jax.block_until_ready(
        preprocess_feature_major(x_km, p_km, packed, tb=256))
    assert out_km.shape == (F_OUT_PAD, 300)
    out2 = np.asarray(out_km)[OUT_ROWS, :].T
    ref2 = np.asarray(reference(x2, presence2, raw))
    np.testing.assert_allclose(out2, ref2, rtol=1e-5, atol=1e-4)

    print("KERNEL_OK")
</pallas_src>

<mosaic_0001>
module attributes {stable_mosaic.version = 11 : i64} {
  func.func @preprocessor_kernel(%arg0: i32, %arg1: memref<16x128xf32, #tpu.memory_space<vmem>>, %arg2: memref<16x128xi8, #tpu.memory_space<vmem>>, %arg3: memref<88x1xf32, #tpu.memory_space<vmem>>, %arg4: memref<24x128xf32, #tpu.memory_space<vmem>>) attributes {dimension_semantics = [#tpu.dimension_semantics<parallel>], iteration_bounds = array<i64: 1>, scalar_prefetch = 0 : i64, scratch_operands = 0 : i64, tpu.core_type = #tpu.core_type<tc>, window_params = [{transform_indices = @transform_0, window_bounds = array<i64: 16, 128>}, {transform_indices = @transform_1, window_bounds = array<i64: 16, 128>}, {pipeline_mode = #tpu.pipeline_mode<synchronous>, transform_indices = @transform_2, window_bounds = array<i64: 88, 1>}, {transform_indices = @transform_3, window_bounds = array<i64: 24, 128>}]} {
    %c0 = arith.constant 0 : index
    %c0_0 = arith.constant 0 : index
    %0 = vector.load %arg3[%c0, %c0_0] : memref<88x1xf32, #tpu.memory_space<vmem>>, vector<88x1xf32>
    %c0_1 = arith.constant 0 : index
    %c0_2 = arith.constant 0 : index
    %1 = vector.load %arg2[%c0_1, %c0_2] : memref<16x128xi8, #tpu.memory_space<vmem>>, vector<8x128xi8>
    %2 = arith.sitofp %1 : vector<8x128xi8> to vector<8x128xf32>
    %c8 = arith.constant 8 : index
    %c0_3 = arith.constant 0 : index
    %3 = vector.load %arg2[%c8, %c0_3] : memref<16x128xi8, #tpu.memory_space<vmem>>, vector<8x128xi8>
    %4 = arith.sitofp %3 : vector<8x128xi8> to vector<8x128xf32>
    %c0_4 = arith.constant 0 : index
    %c0_5 = arith.constant 0 : index
    %5 = vector.load %arg1[%c0_4, %c0_5] : memref<16x128xf32, #tpu.memory_space<vmem>>, vector<2x128xf32>
    %6 = vector.extract_strided_slice %2 {offsets = [0, 0], sizes = [2, 128], strides = [1, 1]} : vector<8x128xf32> to vector<2x128xf32>
    %7 = arith.mulf %5, %6 : vector<2x128xf32>
    %c2 = arith.constant 2 : index
    %c0_6 = arith.constant 0 : index
    %8 = vector.load %arg1[%c2, %c0_6] : memref<16x128xf32, #tpu.memory_space<vmem>>, vector<2x128xf32>
    %cst = arith.constant 0.000000e+00 : f32
    %9 = vector.broadcast %cst : f32 to vector<2x128xf32>
    %10 = arith.cmpf oeq, %8, %9 : vector<2x128xf32>
    %11 = vector.extract_strided_slice %2 {offsets = [2, 0], sizes = [2, 128], strides = [1, 1]} : vector<8x128xf32> to vector<2x128xf32>
    %cst_7 = arith.constant 0.000000e+00 : f32
    %12 = vector.broadcast %cst_7 : f32 to vector<2x128xf32>
    %13 = arith.select %10, %12, %11 : vector<2x128xi1>, vector<2x128xf32>
    %cst_8 = arith.constant -6.000000e+00 : f32
    %cst_9 = arith.constant 6.000000e+00 : f32
    %14 = vector.broadcast %cst_8 : f32 to vector<2x128xf32>
    %15 = arith.maximumf %14, %13 : vector<2x128xf32>
    %16 = vector.broadcast %cst_9 : f32 to vector<2x128xf32>
    %17 = arith.minimumf %16, %15 : vector<2x128xf32>
    %18 = vector.extract_strided_slice %0 {offsets = [4, 0], sizes = [4, 1], strides = [1, 1]} : vector<88x1xf32> to vector<4x1xf32>
    %19 = vector.extract_strided_slice %0 {offsets = [12, 0], sizes = [4, 1], strides = [1, 1]} : vector<88x1xf32> to vector<4x1xf32>
    %c4 = arith.constant 4 : index
    %c0_10 = arith.constant 0 : index
    %20 = vector.load %arg1[%c4, %c0_10] : memref<16x128xf32, #tpu.memory_space<vmem>>, vector<4x128xf32>
    %21 = vector.broadcast %18 : vector<4x1xf32> to vector<4x128xf32>
    %22 = arith.subf %20, %21 : vector<4x128xf32>
    %23 = vector.broadcast %19 : vector<4x1xf32> to vector<4x128xf32>
    %24 = arith.mulf %22, %23 : vector<4x128xf32>
    %25 = vector.extract_strided_slice %2 {offsets = [4, 0], sizes = [4, 128], strides = [1, 1]} : vector<8x128xf32> to vector<4x128xf32>
    %26 = arith.mulf %24, %25 : vector<4x128xf32>
    %cst_11 = arith.constant -6.000000e+00 : f32
    %cst_12 = arith.constant 6.000000e+00 : f32
    %27 = vector.broadcast %cst_11 : f32 to vector<4x128xf32>
    %28 = arith.maximumf %27, %26 : vector<4x128xf32>
    %29 = vector.broadcast %cst_12 : f32 to vector<4x128xf32>
    %30 = arith.minimumf %29, %28 : vector<4x128xf32>
    %31 = tpu.concatenate %7, %17, %30 in 0 : vector<2x128xf32>, vector<2x128xf32>, vector<4x128xf32> -> vector<8x128xf32>
    %c0_13 = arith.constant 0 : index
    %c0_14 = arith.constant 0 : index
    %32 = vector.load %arg4[%c0_13, %c0_14] : memref<24x128xf32, #tpu.memory_space<vmem>>, vector<8x128xf32>
    tpu.vector_store %arg4[%c0_13, %c0_14], %31 {strides = array<i32>} : memref<24x128xf32, #tpu.memory_space<vmem>>, vector<8x128xf32>,
    %c8_15 = arith.constant 8 : index
    %c0_16 = arith.constant 0 : index
    %33 = vector.load %arg1[%c8_15, %c0_16] : memref<16x128xf32, #tpu.memory_space<vmem>>, vector<2x128xf32>
    %cst_17 = arith.constant 9.99999974E-6 : f32
    %cst_18 = arith.constant 0.999989986 : f32
    %34 = vector.broadcast %cst_17 : f32 to vector<2x128xf32>
    %35 = arith.maximumf %34, %33 : vector<2x128xf32>
    %36 = vector.broadcast %cst_18 : f32 to vector<2x128xf32>
    %37 = arith.minimumf %36, %35 : vector<2x128xf32>
    %38 = vector.extract_strided_slice %0 {offsets = [10, 0], sizes = [2, 1], strides = [1, 1]} : vector<88x1xf32> to vector<2x1xf32>
    %c10 = arith.constant 10 : index
    %c0_19 = arith.constant 0 : index
    %39 = vector.load %arg1[%c10, %c0_19] : memref<16x128xf32, #tpu.memory_space<vmem>>, vector<2x128xf32>
    %40 = vector.broadcast %38 : vector<2x1xf32> to vector<2x128xf32>
    %41 = arith.addf %39, %40 : vector<2x128xf32>
    %cst_20 = arith.constant 9.99999997E-7 : f32
    %42 = vector.broadcast %cst_20 : f32 to vector<2x128xf32>
    %43 = arith.maximumf %41, %42 : vector<2x128xf32>
    %cst_21 = arith.constant 1.000000e+00 : f32
    %44 = vector.broadcast %cst_21 : f32 to vector<2x128xf32>
    %45 = arith.subf %44, %37 : vector<2x128xf32>
    %46 = tpu.concatenate %37, %45, %43 in 0 : vector<2x128xf32>, vector<2x128xf32>, vector<2x128xf32> -> vector<6x128xf32>
    %47 = math.log %46 : vector<6x128xf32>
    %48 = vector.extract_strided_slice %47 {offsets = [0, 0], sizes = [2, 128], strides = [1, 1]} : vector<6x128xf32> to vector<2x128xf32>
    %49 = vector.extract_strided_slice %47 {offsets = [2, 0], sizes = [2, 128], strides = [1, 1]} : vector<6x128xf32> to vector<2x128xf32>
    %50 = arith.subf %48, %49 : vector<2x128xf32>
    %51 = vector.extract_strided_slice %4 {offsets = [0, 0], sizes = [2, 128], strides = [1, 1]} : vector<8x128xf32> to vector<2x128xf32>
    %52 = arith.mulf %50, %51 : vector<2x128xf32>
    %cst_22 = arith.constant -6.000000e+00 : f32
    %cst_23 = arith.constant 6.000000e+00 : f32
    %53 = vector.broadcast %cst_22 : f32 to vector<2x128xf32>
    %54 = arith.maximumf %53, %52 : vector<2x128xf32>
    %55 = vector.broadcast %cst_23 : f32 to vector<2x128xf32>
    %56 = arith.minimumf %55, %54 : vector<2x128xf32>
    %57 = vector.extract_strided_slice %0 {offsets = [18, 0], sizes = [2, 1], strides = [1, 1]} : vector<88x1xf32> to vector<2x1xf32>
    %58 = vector.extract_strided_slice %0 {offsets = [26, 0], sizes = [2, 1], strides = [1, 1]} : vector<88x1xf32> to vector<2x1xf32>
    %59 = vector.extract_strided_slice %0 {offsets = [34, 0], sizes = [2, 1], strides = [1, 1]} : vector<88x1xf32> to vector<2x1xf32>
    %60 = vector.extract_strided_slice %0 {offsets = [42, 0], sizes = [2, 1], strides = [1, 1]} : vector<88x1xf32> to vector<2x1xf32>
    %61 = vector.extract_strided_slice %47 {offsets = [4, 0], sizes = [2, 128], strides = [1, 1]} : vector<6x128xf32> to vector<2x128xf32>
    %62 = vector.broadcast %57 : vector<2x1xf32> to vector<2x128xf32>
    %63 = arith.mulf %62, %61 : vector<2x128xf32>
    %64 = math.exp %63 : vector<2x128xf32>
    %cst_24 = arith.constant 1.000000e+00 : f32
    %65 = vector.broadcast %cst_24 : f32 to vector<2x128xf32>
    %66 = arith.subf %64, %65 : vector<2x128xf32>
    %67 = vector.broadcast %58 : vector<2x1xf32> to vector<2x128xf32>
    %68 = arith.mulf %66, %67 : vector<2x128xf32>
    %69 = vector.broadcast %59 : vector<2x1xf32> to vector<2x128xf32>
    %70 = arith.subf %68, %69 : vector<2x128xf32>
    %71 = vector.broadcast %60 : vector<2x1xf32> to vector<2x128xf32>
    %72 = arith.mulf %70, %71 : vector<2x128xf32>
    %73 = vector.extract_strided_slice %4 {offsets = [2, 0], sizes = [2, 128], strides = [1, 1]} : vector<8x128xf32> to vector<2x128xf32>
    %74 = arith.mulf %72, %73 : vector<2x128xf32>
    %cst_25 = arith.constant -6.000000e+00 : f32
    %cst_26 = arith.constant 6.000000e+00 : f32
    %75 = vector.broadcast %cst_25 : f32 to vector<2x128xf32>
    %76 = arith.maximumf %75, %74 : vector<2x128xf32>
    %77 = vector.broadcast %cst_26 : f32 to vector<2x128xf32>
    %78 = arith.minimumf %77, %76 : vector<2x128xf32>
    %c12 = arith.constant 12 : index
    %c0_27 = arith.constant 0 : index
    %79 = vector.load %arg1[%c12, %c0_27] : memref<16x128xf32, #tpu.memory_space<vmem>>, vector<2x128xf32>
    %80 = vector.extract_strided_slice %0 {offsets = [20, 0], sizes = [2, 1], strides = [1, 1]} : vector<88x1xf32> to vector<2x1xf32>
    %81 = vector.extract_strided_slice %0 {offsets = [28, 0], sizes = [2, 1], strides = [1, 1]} : vector<88x1xf32> to vector<2x1xf32>
    %82 = vector.extract_strided_slice %0 {offsets = [36, 0], sizes = [2, 1], strides = [1, 1]} : vector<88x1xf32> to vector<2x1xf32>
    %cst_28 = arith.constant -1.000000e+20 : f32
    %83 = vector.broadcast %cst_28 : f32 to vector<2x128xf32>
    %cst_29 = arith.constant 1.000000e+20 : f32
    %84 = vector.broadcast %cst_29 : f32 to vector<2x128xf32>
    %cst_30 = arith.constant 0.000000e+00 : f32
    %85 = vector.broadcast %cst_30 : f32 to vector<2x128xf32>
    %86 = vector.extract_strided_slice %0 {offsets = [44, 0], sizes = [2, 1], strides = [1, 1]} : vector<88x1xf32> to vector<2x1xf32>
    %87 = vector.broadcast %86 : vector<2x1xf32> to vector<2x128xf32>
    %88 = arith.cmpf oge, %79, %87 : vector<2x128xf32>
    %cst_31 = arith.constant -1.000000e+20 : f32
    %89 = vector.shape_cast %86 : vector<2x1xf32> to vector<2x1xf32>
    %90 = vector.broadcast %89 : vector<2x1xf32> to vector<2x128xf32>
    %91 = vector.broadcast %cst_31 : f32 to vector<2x128xf32>
    %92 = arith.select %88, %90, %91 : vector<2x128xi1>, vector<2x128xf32>
    %93 = arith.maximumf %83, %92 : vector<2x128xf32>
    %cst_32 = arith.constant 1.000000e+20 : f32
    %94 = vector.broadcast %cst_32 : f32 to vector<2x128xf32>
    %95 = vector.shape_cast %86 : vector<2x1xf32> to vector<2x1xf32>
    %96 = vector.broadcast %95 : vector<2x1xf32> to vector<2x128xf32>
    %97 = arith.select %88, %94, %96 : vector<2x128xi1>, vector<2x128xf32>
    %98 = arith.minimumf %84, %97 : vector<2x128xf32>
    %cst_33 = arith.constant 1.000000e+00 : f32
    %cst_34 = arith.constant 0.000000e+00 : f32
    %99 = vector.broadcast %cst_33 : f32 to vector<2x128xf32>
    %100 = vector.broadcast %cst_34 : f32 to vector<2x128xf32>
    %101 = arith.select %88, %99, %100 : vector<2x128xi1>, vector<2x128xf32>
    %102 = arith.addf %85, %101 : vector<2x128xf32>
    %103 = vector.extract_strided_slice %0 {offsets = [52, 0], sizes = [2, 1], strides = [1, 1]} : vector<88x1xf32> to vector<2x1xf32>
    %104 = vector.broadcast %103 : vector<2x1xf32> to vector<2x128xf32>
    %105 = arith.cmpf oge, %79, %104 : vector<2x128xf32>
    %cst_35 = arith.constant -1.000000e+20 : f32
    %106 = vector.shape_cast %103 : vector<2x1xf32> to vector<2x1xf32>
    %107 = vector.broadcast %106 : vector<2x1xf32> to vector<2x128xf32>
    %108 = vector.broadcast %cst_35 : f32 to vector<2x128xf32>
    %109 = arith.select %105, %107, %108 : vector<2x128xi1>, vector<2x128xf32>
    %110 = arith.maximumf %93, %109 : vector<2x128xf32>
    %cst_36 = arith.constant 1.000000e+20 : f32
    %111 = vector.broadcast %cst_36 : f32 to vector<2x128xf32>
    %112 = vector.shape_cast %103 : vector<2x1xf32> to vector<2x1xf32>
    %113 = vector.broadcast %112 : vector<2x1xf32> to vector<2x128xf32>
    %114 = arith.select %105, %111, %113 : vector<2x128xi1>, vector<2x128xf32>
    %115 = arith.minimumf %98, %114 : vector<2x128xf32>
    %cst_37 = arith.constant 1.000000e+00 : f32
    %cst_38 = arith.constant 0.000000e+00 : f32
    %116 = vector.broadcast %cst_37 : f32 to vector<2x128xf32>
    %117 = vector.broadcast %cst_38 : f32 to vector<2x128xf32>
    %118 = arith.select %105, %116, %117 : vector<2x128xi1>, vector<2x128xf32>
    %119 = arith.addf %102, %118 : vector<2x128xf32>
    %120 = vector.extract_strided_slice %0 {offsets = [60, 0], sizes = [2, 1], strides = [1, 1]} : vector<88x1xf32> to vector<2x1xf32>
    %121 = vector.broadcast %120 : vector<2x1xf32> to vector<2x128xf32>
    %122 = arith.cmpf oge, %79, %121 : vector<2x128xf32>
    %cst_39 = arith.constant -1.000000e+20 : f32
    %123 = vector.shape_cast %120 : vector<2x1xf32> to vector<2x1xf32>
    %124 = vector.broadcast %123 : vector<2x1xf32> to vector<2x128xf32>
    %125 = vector.broadcast %cst_39 : f32 to vector<2x128xf32>
    %126 = arith.select %122, %124, %125 : vector<2x128xi1>, vector<2x128xf32>
    %127 = arith.maximumf %110, %126 : vector<2x128xf32>
    %cst_40 = arith.constant 1.000000e+20 : f32
    %128 = vector.broadcast %cst_40 : f32 to vector<2x128xf32>
    %129 = vector.shape_cast %120 : vector<2x1xf32> to vector<2x1xf32>
    %130 = vector.broadcast %129 : vector<2x1xf32> to vector<2x128xf32>
    %131 = arith.select %122, %128, %130 : vector<2x128xi1>, vector<2x128xf32>
    %132 = arith.minimumf %115, %131 : vector<2x128xf32>
    %cst_41 = arith.constant 1.000000e+00 : f32
    %cst_42 = arith.constant 0.000000e+00 : f32
    %133 = vector.broadcast %cst_41 : f32 to vector<2x128xf32>
    %134 = vector.broadcast %cst_42 : f32 to vector<2x128xf32>
    %135 = arith.select %122, %133, %134 : vector<2x128xi1>, vector<2x128xf32>
    %136 = arith.addf %119, %135 : vector<2x128xf32>
    %137 = vector.extract_strided_slice %0 {offsets = [68, 0], sizes = [2, 1], strides = [1, 1]} : vector<88x1xf32> to vector<2x1xf32>
    %138 = vector.broadcast %137 : vector<2x1xf32> to vector<2x128xf32>
    %139 = arith.cmpf oge, %79, %138 : vector<2x128xf32>
    %cst_43 = arith.constant -1.000000e+20 : f32
    %140 = vector.shape_cast %137 : vector<2x1xf32> to vector<2x1xf32>
    %141 = vector.broadcast %140 : vector<2x1xf32> to vector<2x128xf32>
    %142 = vector.broadcast %cst_43 : f32 to vector<2x128xf32>
    %143 = arith.select %139, %141, %142 : vector<2x128xi1>, vector<2x128xf32>
    %144 = arith.maximumf %127, %143 : vector<2x128xf32>
    %cst_44 = arith.constant 1.000000e+20 : f32
    %145 = vector.broadcast %cst_44 : f32 to vector<2x128xf32>
    %146 = vector.shape_cast %137 : vector<2x1xf32> to vector<2x1xf32>
    %147 = vector.broadcast %146 : vector<2x1xf32> to vector<2x128xf32>
    %148 = arith.select %139, %145, %147 : vector<2x128xi1>, vector<2x128xf32>
    %149 = arith.minimumf %132, %148 : vector<2x128xf32>
    %cst_45 = arith.constant 1.000000e+00 : f32
    %cst_46 = arith.constant 0.000000e+00 : f32
    %150 = vector.broadcast %cst_45 : f32 to vector<2x128xf32>
    %151 = vector.broadcast %cst_46 : f32 to vector<2x128xf32>
    %152 = arith.select %139, %150, %151 : vector<2x128xi1>, vector<2x128xf32>
    %153 = arith.addf %136, %152 : vector<2x128xf32>
    %154 = vector.extract_strided_slice %0 {offsets = [76, 0], sizes = [2, 1], strides = [1, 1]} : vector<88x1xf32> to vector<2x1xf32>
    %155 = vector.broadcast %154 : vector<2x1xf32> to vector<2x128xf32>
    %156 = arith.cmpf oge, %79, %155 : vector<2x128xf32>
    %cst_47 = arith.constant -1.000000e+20 : f32
    %157 = vector.shape_cast %154 : vector<2x1xf32> to vector<2x1xf32>
    %158 = vector.broadcast %157 : vector<2x1xf32> to vector<2x128xf32>
    %159 = vector.broadcast %cst_47 : f32 to vector<2x128xf32>
    %160 = arith.select %156, %158, %159 : vector<2x128xi1>, vector<2x128xf32>
    %161 = arith.maximumf %144, %160 : vector<2x128xf32>
    %cst_48 = arith.constant 1.000000e+20 : f32
    %162 = vector.broadcast %cst_48 : f32 to vector<2x128xf32>
    %163 = vector.shape_cast %154 : vector<2x1xf32> to vector<2x1xf32>
    %164 = vector.broadcast %163 : vector<2x1xf32> to vector<2x128xf32>
    %165 = arith.select %156, %162, %164 : vector<2x128xi1>, vector<2x128xf32>
    %166 = arith.minimumf %149, %165 : vector<2x128xf32>
    %cst_49 = arith.constant 1.000000e+00 : f32
    %cst_50 = arith.constant 0.000000e+00 : f32
    %167 = vector.broadcast %cst_49 : f32 to vector<2x128xf32>
    %168 = vector.broadcast %cst_50 : f32 to vector<2x128xf32>
    %169 = arith.select %156, %167, %168 : vector<2x128xi1>, vector<2x128xf32>
    %170 = arith.addf %153, %169 : vector<2x128xf32>
    %171 = vector.broadcast %80 : vector<2x1xf32> to vector<2x128xf32>
    %172 = arith.cmpf oge, %79, %171 : vector<2x128xf32>
    %cst_51 = arith.constant 1.000000e+00 : f32
    %cst_52 = arith.constant 0.000000e+00 : f32
    %173 = vector.broadcast %cst_51 : f32 to vector<2x128xf32>
    %174 = vector.broadcast %cst_52 : f32 to vector<2x128xf32>
    %175 = arith.select %172, %173, %174 : vector<2x128xi1>, vector<2x128xf32>
    %176 = vector.broadcast %81 : vector<2x1xf32> to vector<2x128xf32>
    %177 = arith.cmpf ole, %79, %176 : vector<2x128xf32>
    %cst_53 = arith.constant 1.000000e+00 : f32
    %cst_54 = arith.constant 0.000000e+00 : f32
    %178 = vector.broadcast %cst_53 : f32 to vector<2x128xf32>
    %179 = vector.broadcast %cst_54 : f32 to vector<2x128xf32>
    %180 = arith.select %177, %178, %179 : vector<2x128xi1>, vector<2x128xf32>
    %181 = arith.addf %180, %175 : vector<2x128xf32>
    %cst_55 = arith.constant 0.00999999977 : f32
    %182 = vector.broadcast %cst_55 : f32 to vector<2x128xf32>
    %183 = arith.cmpf olt, %181, %182 : vector<2x128xf32>
    %cst_56 = arith.constant 1.000000e+00 : f32
    %cst_57 = arith.constant 0.000000e+00 : f32
    %184 = vector.broadcast %cst_56 : f32 to vector<2x128xf32>
    %185 = vector.broadcast %cst_57 : f32 to vector<2x128xf32>
    %186 = arith.select %183, %184, %185 : vector<2x128xi1>, vector<2x128xf32>
    %cst_58 = arith.constant 1.000000e+00 : f32
    %187 = vector.broadcast %cst_58 : f32 to vector<2x128xf32>
    %188 = arith.subf %170, %187 : vector<2x128xf32>
    %189 = arith.subf %79, %161 : vector<2x128xf32>
    %cst_59 = arith.constant 9.99999997E-7 : f32
    %190 = vector.broadcast %cst_59 : f32 to vector<2x128xf32>
    %191 = arith.addf %166, %190 : vector<2x128xf32>
    %192 = arith.subf %191, %161 : vector<2x128xf32>
    %193 = arith.divf %189, %192 : vector<2x128xf32>
    %194 = arith.addf %188, %193 : vector<2x128xf32>
    %195 = vector.broadcast %82 : vector<2x1xf32> to vector<2x128xf32>
    %196 = arith.mulf %194, %195 : vector<2x128xf32>
    %197 = arith.mulf %186, %196 : vector<2x128xf32>
    %198 = arith.addf %175, %197 : vector<2x128xf32>
    %199 = vector.extract_strided_slice %4 {offsets = [4, 0], sizes = [2, 128], strides = [1, 1]} : vector<8x128xf32> to vector<2x128xf32>
    %200 = arith.mulf %198, %199 : vector<2x128xf32>
    %cst_60 = arith.constant -6.000000e+00 : f32
    %cst_61 = arith.constant 6.000000e+00 : f32
    %201 = vector.broadcast %cst_60 : f32 to vector<2x128xf32>
    %202 = arith.maximumf %201, %200 : vector<2x128xf32>
    %203 = vector.broadcast %cst_61 : f32 to vector<2x128xf32>
    %204 = arith.minimumf %203, %202 : vector<2x128xf32>
    %cst_62 = arith.constant 0.000000e+00 : f32
    %205 = vector.broadcast %cst_62 : f32 to vector<2x128xf32>
    %206 = tpu.concatenate %56, %78, %204, %205 in 0 : vector<2x128xf32>, vector<2x128xf32>, vector<2x128xf32>, vector<2x128xf32> -> vector<8x128xf32>
    %c8_63 = arith.constant 8 : index
    %c0_64 = arith.constant 0 : index
    %207 = vector.load %arg4[%c8_63, %c0_64] : memref<24x128xf32, #tpu.memory_space<vmem>>, vector<8x128xf32>
    tpu.vector_store %arg4[%c8_63, %c0_64], %206 {strides = array<i32>} : memref<24x128xf32, #tpu.memory_space<vmem>>, vector<8x128xf32>,
    %c14 = arith.constant 14 : index
    %c0_65 = arith.constant 0 : index
    %208 = vector.load %arg1[%c14, %c0_65] : memref<16x128xf32, #tpu.memory_space<vmem>>, vector<2x128xf32>
    %209 = vector.extract_strided_slice %0 {offsets = [80, 0], sizes = [3, 1], strides = [1, 1]} : vector<88x1xf32> to vector<3x1xf32>
    %210 = vector.extract_strided_slice %0 {offsets = [83, 0], sizes = [4, 1], strides = [1, 1]} : vector<88x1xf32> to vector<4x1xf32>
    %211 = vector.extract_strided_slice %208 {offsets = [0, 0], sizes = [1, 128], strides = [1, 1]} : vector<2x128xf32> to vector<1x128xf32>
    %212 = vector.broadcast %211 : vector<1x128xf32> to vector<3x128xf32>
    %213 = vector.broadcast %209 : vector<3x1xf32> to vector<3x128xf32>
    %214 = arith.cmpf oeq, %212, %213 : vector<3x128xf32>
    %215 = vector.extract_strided_slice %4 {offsets = [6, 0], sizes = [1, 128], strides = [1, 1]} : vector<8x128xf32> to vector<1x128xf32>
    %cst_66 = arith.constant 0.000000e+00 : f32
    %216 = vector.shape_cast %215 : vector<1x128xf32> to vector<1x128xf32>
    %217 = vector.broadcast %216 : vector<1x128xf32> to vector<3x128xf32>
    %218 = vector.broadcast %cst_66 : f32 to vector<3x128xf32>
    %219 = arith.select %214, %217, %218 : vector<3x128xi1>, vector<3x128xf32>
    %220 = vector.extract_strided_slice %208 {offsets = [1, 0], sizes = [1, 128], strides = [1, 1]} : vector<2x128xf32> to vector<1x128xf32>
    %221 = vector.broadcast %220 : vector<1x128xf32> to vector<4x128xf32>
    %222 = vector.broadcast %210 : vector<4x1xf32> to vector<4x128xf32>
    %223 = arith.cmpf oeq, %221, %222 : vector<4x128xf32>
    %224 = vector.extract_strided_slice %4 {offsets = [7, 0], sizes = [1, 128], strides = [1, 1]} : vector<8x128xf32> to vector<1x128xf32>
    %cst_67 = arith.constant 0.000000e+00 : f32
    %225 = vector.shape_cast %224 : vector<1x128xf32> to vector<1x128xf32>
    %226 = vector.broadcast %225 : vector<1x128xf32> to vector<4x128xf32>
    %227 = vector.broadcast %cst_67 : f32 to vector<4x128xf32>
    %228 = arith.select %223, %226, %227 : vector<4x128xi1>, vector<4x128xf32>
    %cst_68 = arith.constant 0.000000e+00 : f32
    %229 = vector.broadcast %cst_68 : f32 to vector<1x128xf32>
    %230 = tpu.concatenate %219, %228, %229 in 0 : vector<3x128xf32>, vector<4x128xf32>, vector<1x128xf32> -> vector<8x128xf32>
    %c16 = arith.constant 16 : index
    %c0_69 = arith.constant 0 : index
    %231 = vector.load %arg4[%c16, %c0_69] : memref<24x128xf32, #tpu.memory_space<vmem>>, vector<8x128xf32>
    tpu.vector_store %arg4[%c16, %c0_69], %230 {strides = array<i32>} : memref<24x128xf32, #tpu.memory_space<vmem>>, vector<8x128xf32>,
    return
  }
  func.func @transform_0(%arg0: i32) -> (i32, i32) {
    %c0_i32 = arith.constant 0 : i32
    %c0_i32_0 = arith.constant 0 : i32
    return %c0_i32, %arg0 : i32, i32
  }
  func.func @transform_1(%arg0: i32) -> (i32, i32) {
    %c0_i32 = arith.constant 0 : i32
    %c0_i32_0 = arith.constant 0 : i32
    return %c0_i32, %arg0 : i32, i32
  }
  func.func @transform_2(%arg0: i32) -> (i32, i32) {
    %c0_i32 = arith.constant 0 : i32
    %c0_i32_0 = arith.constant 0 : i32
    %c0_i32_1 = arith.constant 0 : i32
    return %c0_i32, %c0_i32_0 : i32, i32
  }
  func.func @transform_3(%arg0: i32) -> (i32, i32) {
    %c0_i32 = arith.constant 0 : i32
    %c0_i32_0 = arith.constant 0 : i32
    return %c0_i32, %arg0 : i32, i32
  }
}

</mosaic_0001>

<bundles_post_ra>
// kernel: preprocess_feature_major.1
= control target key start
LH: loop header
LB: loop body
LE: loop exit
PB: predicated region body
PF: predicated region fallthrough
CT: control target
= control target key end

     0   :  { %v323_v2 = vmov 0   ;;  %s528_s0 = inlined_call_operand.vmem [shape: f32[16,128], index: 0, kind: input, shape index: {}]   ;;  %s529_s1 = inlined_call_operand.vmem [shape: s8[16,128], index: 1, kind: input, shape index: {}]   ;;  %s530_s2 = inlined_call_operand.vmem [shape: f32[88,1], index: 2, kind: input, shape index: {}]   ;;  %s531_s3 = inlined_call_operand.hbm [shape: f32[24,128], index: 3, kind: output, shape index: {}]  }
   0x1   :  { %v21_v0 = vld [vmem:[%s530_s2 + $0x30] sm:$0xff]  ;;  %v16_v1 = vld [vmem:[%s530_s2 + $0x8] sm:$0xff]  ;;  %292 = vset.pattern.permute.xlu1 %v323_v2  ;;  %291 = vset.pattern.permute.xlu0 %v323_v2  ;;  %v22_v3 = vld [vmem:[%s530_s2 + $0x38] sm:$0xff] }
   0x2   :  { %141 = vperm.xlu1 %292, %v21_v0   ;;  %52 = vperm.xlu0 %291, %v16_v1   ;;  %v20_v4 = vld [vmem:[%s530_s2 + $0x28] sm:$0xff] }
   0x3   :  { %8 = vsyncpa [#allocation3], 0  ;;  %v24_v5 = vld [vmem:[%s530_s2 + $0x48] sm:$0xff]  ;;  %v23_v6 = vld [vmem:[%s530_s2 + $0x40] sm:$0xff]  ;;  %v229_v17 = vlaneseq  ;;  %vm68_vm0 = vcmask 1041408   ;;  %vm70_vm1 = vcmask 1043456  }
   0x4   :  { %v18_v7 = vld [vmem:[%s530_s2 + $0x18] sm:$0xff]  ;;  %v17_v8 = vld [vmem:[%s530_s2 + $0x10] sm:$0xff]  ;;  %v19_v9 = vld [vmem:[%s530_s2 + $0x20] sm:$0xff]  ;;  %v324_v61 = vmov 0.0   ;;  %vm254_vm8 = vcmask 1042432   ;;  %vm256_vm9 = vcmask 1046528  }
   0x5   :  { %v15_v10 = vld [vmem:[%s530_s2] sm:$0xff]  ;;  %v25_v11 = vld [vmem:[%s530_s2 + $0x50] sm:$0xff]  ;;  %v73_v12 = vld [vmem:[%s528_s0 + $0x8] sm:$0x3]  ;;  %v393_v26 = vshrl.u32 %v229_v17, 7  ;;  %vm225_vm15 = vcmask 1045504  }
   0x6   :  { %154 = vperm.xlu1 %292, %v22_v3   ;;  %122 = vperm.xlu0 %291, %v20_v4   ;;  %v74_v13 = vmax.f32 %v73_v12, 1e-05  ;;  %v283_v15 = vld [vmem:[%s529_s1] sm:$0xf]   ;;  %v76_v19 = vld [vmem:[%s528_s0 + $0xa] sm:$0x3] }
   0x7   :  { %v284_v21 = vunpack.c.0.s8 %v283_v15  ;;  %v398_v27 = vld [vmem:[%s528_s0 + $0xc] sm:$0x3]  ;;  %v34_v34 = vld [vmem:[%s528_s0 + $0x2] sm:$0x3]  ;;  %v285_v35 = vunpack.c.1.s8 %v283_v15  ;;  %v231_v38 = vsub.s32 0, %v393_v26  ;;  %v241_v52 = vsub.s32 6, %v393_v26 }
   0x8   :  { %v75_v14 = vmin.f32 %v74_v13, 0.99999  ;;  %vm35_vm4 = vcmp.eq.f32.partialorder %v34_v34, 0.0  ;;  %v246_v53 = vsub.s32 1, %v393_v26  ;;  %v228_v59 = vld [vmem:[%s528_s0 + $0xe] sm:$0x3] }
   0x9   :  { %v402_v30 = vcvt.s32.f32 %v284_v21  ;;  %v427_v51 = vcvt.s32.f32 %v285_v35  ;;  %v251_v60 = vsub.s32 7, %v393_v26  ;;  %v42_v12 = vld [vmem:[%s528_s0 + $0x4] sm:$0xf]  ;;  %v32_v17 = vld [vmem:[%s528_s0] sm:$0x3]  ;;  %s325_s0 = smov [#allocation2]  }
   0xa   :  { %180 = vperm.xlu1 %292, %v24_v5   ;;  %167 = vperm.xlu0 %291, %v23_v6   ;;  %v81_v16 = vsub.f32 1.0, %v75_v14  ;;  %v232_v6 = vrot.slane %v228_v59, %v231_v38  ;;  %s264_s21 = sshll.u32 %s325_s0, 4  ;;  %s265_s21 = int_to_ptr.vmem [resolvable:$true] %s264_s21 }
   0xb   :  { %v37_v43 = vrot.slane %v402_v30, 2  ;;  %s299_s22 = scalar_lea.vmem %s265_s21, 384  ;;  %p304_p1 = scmp.lt.s32.totalorder %s265_s21, %s265_s21 }
   0xc   :  { %v83_v23 = vrot.slane %v81_v16, 6  ;;  %p300_p0 = scmp.ne.s32.totalorder %s265_s21, %s299_s22  ;;  %p305_p2 = scmp.lt.s32.totalorder %s299_s22, %s299_s22 }
   0xd   :  { %v39_v58 = vsel %vm35_vm4, 0.0, %v37_v43 }
   0xe   :  { %110 = vperm.xlu1 %292, %v18_v7   ;;  %101 = vperm.xlu0 %291, %v17_v8   ;;  %v88_v36 = vsel %vm68_vm0, %v75_v14, %v83_v23  ;;  %v247_v7 = vrot.slane %v228_v59, %v246_v53  ;;  %v242_v14 = vrot.slane %v427_v51, %v241_v52  ;;  %v57_v23 = vrot.slane %v402_v30, 4  ;;  %p306_p3 = por %p305_p2, %p304_p1 }
  0x10   :  { %p307_p4 = pnand %p306_p3, %p300_p0 }
  0x12   :  { %116 = vperm.xlu0 %291, %v19_v9   ;;  %45 = vperm.xlu1 %292, %v15_v10  }
  0x16   :  { %235 = vperm.xlu0 %291, %v25_v11   ;;  %v275_v11 = vclamps-f32 %v39_v58, 6.0 }
  0x18   :  { %v63_v34 = vrot.slane %v275_v11, 6 }
  0x81   :  { %v142_v18 = vpop.permute.xlu1 %141  ;;  %v390_v20 = vpop.permute.xlu0 %52 }
  0x82   :  { %v77_v22 = vrot.slane %v390_v20, 2  ;;  %v143_v24 = vrot.slane %v142_v18, 4 }
  0x84   :  { %v79_v25 = vadd.f32 %v77_v22, %v76_v19  ;;  %vm145_vm2 = vcmp.ge.f32.partialorder %v398_v27, %v143_v24  ;;  %v252_v19 = vrot.slane %v427_v51, %v251_v60 }
  0x85   :  { %v155_v28 = vpop.permute.xlu1 %154  ;;  %v400_v29 = vpop.permute.xlu0 %122  ;;  %v146_v39 = vsel %vm145_vm2, %v143_v24, -1e+20  ;;  %v148_v40 = vsel %vm145_vm2, 1e+20, %v143_v24  ;;  %v150_v62 = vsel %vm145_vm2, 1.0, %v324_v61  ;;  %v54_v24 = vrot.slane %v390_v20, 4 }
  0x86   :  { %v80_v31 = vmax.f32 %v79_v25, 1e-06  ;;  %v156_v32 = vrot.slane %v155_v28, 4  ;;  %v130_v33 = vrot.slane %v400_v29, 4 }
  0x88   :  { %v86_v37 = vrot.slane %v80_v31, 4  ;;  %vm132_vm3 = vcmp.ge.f32.partialorder %v398_v27, %v130_v33  ;;  %vm158_vm5 = vcmp.ge.f32.partialorder %v398_v27, %v156_v32 }
  0x89   :  { %v181_v41 = vpop.permute.xlu1 %180  ;;  %v168_v42 = vpop.permute.xlu0 %167  ;;  %v133_v44 = vsel %vm132_vm3, %v130_v33, -1e+20  ;;  %v135_v45 = vsel %vm132_vm3, 1e+20, %v130_v33  ;;  %v159_v63 = vsel %vm158_vm5, %v156_v32, -1e+20  ;;  %v33_v33 = vmul.f32 %v32_v17, %v402_v30 }
  0x8a   :  { %v422_v46 = vrot.slane %v181_v41, 4  ;;  %v134_v47 = vmax.f32 %v133_v44, -1e+20  ;;  %v136_v48 = vmin.f32 %v135_v45, 1e+20  ;;  %v424_v49 = vrot.slane %v168_v42, 4 }
  0x8b   :  { %v89_v50 = vsel %vm70_vm1, %v88_v36, %v86_v37  ;;  %v161_v0 = vsel %vm158_vm5, 1e+20, %v156_v32  ;;  %v137_v1 = vsel %vm132_vm3, 1.0, %v324_v61  ;;  %v163_v21 = vsel %vm158_vm5, 1.0, %v324_v61 }
  0x8c   :  { %293 = vlog2.f32 %v89_v50  ;;  %v147_v54 = vmax.f32 %v134_v47, %v146_v39  ;;  %v149_v55 = vmin.f32 %v136_v48, %v148_v40  ;;  %vm171_vm6 = vcmp.ge.f32.partialorder %v398_v27, %v424_v49 }
  0x8d   :  { %v431_v56 = vpop.permute.xlu1 %110  ;;  %v433_v57 = vpop.permute.xlu0 %101  ;;  %vm184_vm7 = vcmp.ge.f32.partialorder %v398_v27, %v422_v46  ;;  %v172_v4 = vsel %vm171_vm6, %v424_v49, -1e+20  ;;  %v174_v5 = vsel %vm171_vm6, 1e+20, %v424_v49  ;;  %v151_v15 = vadd.f32 %v150_v62, %v137_v1 }
  0x8e   :  { %v160_v2 = vmax.f32 %v147_v54, %v159_v63  ;;  %v162_v3 = vmin.f32 %v149_v55, %v161_v0  ;;  %v187_v16 = vsel %vm184_vm7, 1e+20, %v422_v46  ;;  %v185_v25 = vsel %vm184_vm7, %v422_v46, -1e+20 }
  0x8f   :  { %v164_v36 = vadd.f32 %v163_v21, %v151_v15  ;;  %v195_v41 = vrot.slane %v431_v56, 4  ;;  %v191_v42 = vrot.slane %v433_v57, 4  ;;  %v176_v30 = vsel %vm171_vm6, 1.0, %v324_v61 }
  0x90   :  { %v173_v8 = vmax.f32 %v160_v2, %v172_v4  ;;  %v175_v9 = vmin.f32 %v162_v3, %v174_v5  ;;  %v69_v52 = vsel %vm68_vm0, %v33_v33, %v63_v34  ;;  %v189_v58 = vsel %vm184_vm7, 1.0, %v324_v61 }
  0x91   :  { %v462_v10 = vpop.permute.xlu0 %116  ;;  %v46_v13 = vpop.permute.xlu1 %45  ;;  %v177_v53 = vadd.f32 %v176_v30, %v164_v36  ;;  %vm197_vm12 = vcmp.le.f32.partialorder %v398_v27, %v195_v41  ;;  %vm193_vm13 = vcmp.ge.f32.partialorder %v398_v27, %v191_v42 }
  0x92   :  { %v47_v18 = vrot.slane %v46_v13, 4  ;;  %v188_v22 = vmin.f32 %v175_v9, %v187_v16  ;;  %v186_v28 = vmax.f32 %v173_v8, %v185_v25  ;;  %v198_v59 = vsel %vm197_vm12, 1.0, %v324_v61 }
  0x93   :  { %v190_v60 = vadd.f32 %v189_v58, %v177_v53  ;;  %v209_v4 = vrot.slane %v462_v10, 4  ;;  %v215_v8 = vrot.slane %v427_v51, 4 }
  0x94   :  { %v49_v26 = vsub.f32 %v42_v12, %v47_v18  ;;  %v204_v31 = vadd.f32 1e-06, %v188_v22  ;;  %v203_v63 = vsub.f32 %v398_v27, %v186_v28 }
  0x95   :  { %v236_v32 = vpop.permute.xlu0 %235  ;;  %v280_v1 = vadd.f32 -1.0, %v190_v60 }
  0x96   :  { %v294_v35 = vpop.eup %293  ;;  %v56_v37 = vmul.f32 %v54_v24, %v49_v26  ;;  %vm238_vm10 = vcmp.eq.f32.partialorder %v232_v6, %v236_v32  ;;  %vm248_vm11 = vcmp.eq.f32.partialorder %v247_v7, %v236_v32  ;;  %v205_v38 = vsub.f32 %v204_v31, %v186_v28 }
  0x97   :  { %v91_v20 = vmul.f32 0.6931472, %v294_v35  ;;  %v243_v39 = vsel %vm238_vm10, %v242_v14, 0.0  ;;  %v253_v40 = vsel %vm248_vm11, %v252_v19, 0.0 }
  0x98   :  { %v59_v43 = vmul.f32 %v57_v23, %v56_v37  ;;  %v255_v44 = vsel %vm254_vm8, %v243_v39, %v253_v40  ;;  %295 = vrcp.f32 %v205_v38 }
  0x99   :  { %v93_v45 = vrot.slane %v91_v20, 2  ;;  %v257_v47 = vsel %vm256_vm9, %v255_v44, 0.0 }
  0x9a   :  { %v276_v48 = vclamps-f32 %v59_v43, 6.0  ;;  %258 = vst [vmem:[#allocation2 + $0x10] sm:$0xff] %v257_v47 }
  0x9b   :  { %v104_v50 = vmul.f32 %v433_v57, %v93_v45  ;;  %v194_v57 = vsel %vm193_vm13, 1.0, %v324_v61  ;;  %v95_v11 = vsub.f32 %v91_v20, %v93_v45 }
  0x9c   :  { %v66_v54 = vrot.slane %v276_v48, 4  ;;  %v199_v62 = vadd.f32 %v198_v59, %v194_v57 }
  0x9d   :  { %v105_v55 = vmul.f32 1.442695, %v104_v50  ;;  %v96_v15 = vmul.f32 %v95_v11, %v427_v51 }
  0x9e   :  { %v71_v49 = vsel %vm70_vm1, %v69_v52, %v66_v54  ;;  %vm200_vm14 = vcmp.lt.f32.partialorder %v199_v62, 0.01 }
  0x9f   :  { %297 = vpow2.f32 %v105_v55  ;;  %72 = vst [vmem:[#allocation2] sm:$0xff] %v71_v49  ;;  %v201_v6 = vsel %vm200_vm14, 1.0, %v324_v61  ;;  %v277_v19 = vclamps-f32 %v96_v15, 6.0 }
  0xa2   :  { %v296_v0 = vpop.eup %295 }
  0xa3   :  { %v207_v2 = vmul.f32 %v296_v0, %v203_v63 }
  0xa5   :  { %v208_v3 = vadd.f32 %v280_v1, %v207_v2 }
  0xa7   :  { %v211_v5 = vmul.f32 %v209_v4, %v208_v3 }
  0xa9   :  { %v298_v46 = vpop.eup %297  ;;  %v212_v9 = vmul.f32 %v211_v5, %v201_v6 }
  0xaa   :  { %v278_v7 = vadd.f32 -1.0, %v298_v46 }
  0xab   :  { %v213_v13 = vadd.f32 %v212_v9, %v194_v57 }
  0xac   :  { %v113_v12 = vmul.f32 %v278_v7, %v431_v56 }
  0xad   :  { %v217_v14 = vmul.f32 %v215_v8, %v213_v13 }
  0xae   :  { %v119_v27 = vsub.f32 %v113_v12, %v462_v10 }
  0xaf   :  { %v281_v17 = vclamps-f32 %v217_v14, 6.0 }
  0xb0   :  { %v125_v16 = vmul.f32 %v400_v29, %v119_v27 }
  0xb1   :  { %v221_v21 = vrot.slane %v281_v17, 4 }
  0xb2   :  { %v126_v18 = vmul.f32 %v125_v16, %v427_v51 }
  0xb4   :  { %v279_v61 = vclamps-f32 %v126_v18, 6.0 }
  0xb6   :  { %v223_v22 = vsel %vm68_vm0, %v277_v19, %v279_v61 }
  0xb7   :  { %v224_v56 = vsel %vm70_vm1, %v223_v22, %v221_v21 }
  0xb8   :  { %v226_v10 = vsel %vm225_vm15, %v224_v56, 0.0 }
  0xb9   :  { %227 = vst [vmem:[#allocation2 + $0x8] sm:$0xff] %v226_v10 }
  0xba   :  { %310 = shalt.err (!%p307_p4)
}
  0xbb   :  { %s311_s25 = scalar_lea.hbm %s531_s3, 384 }
  0xbc   :  { %p312_p5 = scmp.ne.s32.totalorder %s531_s3, %s311_s25  ;;  %p315_p6 = scmp.lt.u32.totalorder %s311_s25, %s531_s3 }
  0xbe   :  { %p317_p7 = pnand %p315_p6, %p312_p5 }
  0xc0   :  { %320 = shalt.err (!%p317_p7)
}
  0xc1   :  { %s326_s30 = smov 128   ;;  %s327_s4 = smov 8  }
  0xc2   :  { %270 = dma.vmem_to_hbm [thread:$0]  %s265_s21, 384, %s531_s3, [#allocation3], %s326_s30, %s326_s30, %s327_s4  }
  0xc3   :  { %321 = dma.done.wait [#allocation3], 384  }
  0xc4   :  { %322 = vsyncadd [#allocation3], 4294966912 }
  0xc5   :  { %274 = vsyncpa [#allocation3], 1 }

</bundles_post_ra>
